<compile_context>
chip_gen: v7x
topology: tpu7x:2x2x1
jax: 0.10.0
libtpu: 0.0.40
codegen_flags: <defaults>
</compile_context>

<pallas_src>
import math

import jax
import jax.numpy as jnp
from jax.experimental import pallas as pl
from jax.experimental.pallas import tpu as pltpu

LANE = 128  # TPU lane width — every feature dim is padded to a multiple of this.


def _leaky_relu(v, slope=0.05):
    return jnp.where(v >= 0, v, slope * v)


def mlp_generator_kernel(x_ref,
                         w1_ref, b1_ref,
                         w2_ref, b2_ref,
                         w3_ref, b3_ref,
                         w4_ref, b4_ref,
                         o_ref):
    """One (TB, 128) batch tile of the fused 4-layer MLP.

    Matmul inputs are bf16 (MXU-native) with f32 accumulation; the elementwise
    chain (bias add, leaky-relu, tanh) stays in f32 (cheap on VPU/EUP, avoids
    bf16 VALU decomposition on v5e).
    """
    h = jnp.dot(x_ref[...], w1_ref[...], preferred_element_type=jnp.float32)
    h = _leaky_relu(h + b1_ref[...])

    h = jnp.dot(h.astype(jnp.bfloat16), w2_ref[...],
                preferred_element_type=jnp.float32)
    h = _leaky_relu(h + b2_ref[...])

    h = jnp.dot(h.astype(jnp.bfloat16), w3_ref[...],
                preferred_element_type=jnp.float32)
    h = _leaky_relu(h + b3_ref[...])

    h = jnp.dot(h.astype(jnp.bfloat16), w4_ref[...],
                preferred_element_type=jnp.float32)
    o_ref[...] = jnp.tanh(h + b4_ref[...])


def _round_up(n, m):
    return ((n + m - 1) // m) * m


def _pad2d(a, rows, cols):
    r, c = a.shape
    return jnp.pad(a, ((0, rows - r), (0, cols - c)))


def pad_params(params):
    """Zero-pad all feature dims to multiples of 128 lanes; weights -> bf16."""
    padded = []
    for w, b in params:
        fi, fo = w.shape
        fi_p, fo_p = _round_up(fi, LANE), _round_up(fo, LANE)
        w_p = _pad2d(w, fi_p, fo_p).astype(jnp.bfloat16)   # zero rows/cols
        b_p = _pad2d(b, 1, fo_p).astype(jnp.float32)        # padded cols stay 0
        padded.append((w_p, b_p))
    return padded


def simple_generator(x, padded_params, out_dim, *, batch_tile=128):
    """x: (B, noise_dim) f32 -> (B, out_dim) f32."""
    (w1, b1), (w2, b2), (w3, b3), (w4, b4) = padded_params
    B, _ = x.shape
    in_pad = w1.shape[0]
    out_pad = w4.shape[1]

    tb = min(batch_tile, _round_up(B, 8))   # sublane-aligned batch tile
    b_pad = _round_up(B, tb)

    # Lane-dense bf16 input slab (halves the x DMA bytes).
    x_p = _pad2d(x, b_pad, in_pad).astype(jnp.bfloat16)

    grid = (b_pad // tb,)
    resident = lambda shape: pl.BlockSpec(shape, lambda i: (0, 0))

    y_pad = pl.pallas_call(
        mlp_generator_kernel,
        out_shape=jax.ShapeDtypeStruct((b_pad, out_pad), jnp.float32),
        grid=grid,
        in_specs=[
            pl.BlockSpec((tb, in_pad), lambda i: (i, 0)),   # x: batch-tiled
            resident(w1.shape), resident(b1.shape),          # weights/biases:
            resident(w2.shape), resident(b2.shape),          # VMEM-resident
            resident(w3.shape), resident(b3.shape),          # across the grid
            resident(w4.shape), resident(b4.shape),
        ],
        out_specs=pl.BlockSpec((tb, out_pad), lambda i: (i, 0)),
        compiler_params=pltpu.CompilerParams(
            dimension_semantics=("parallel",)),               # 2 TCs on v7x
    )(x_p, w1, b1, w2, b2, w3, b3, w4, b4)

    return y_pad[:B, :out_dim]


def init_params(key, noise_dim, hidden_dim, out_dim):
    """Deterministic synthetic init (uniform, torch-Linear-like fan-in scaling)."""
    dims = [(noise_dim, hidden_dim),
            (hidden_dim, hidden_dim),
            (hidden_dim, hidden_dim),
            (hidden_dim, out_dim)]
    params = []
    for fan_in, fan_out in dims:
        key, kw, kb = jax.random.split(key, 3)
        bound = 1.0 / math.sqrt(fan_in)
        w = jax.random.uniform(kw, (fan_in, fan_out), jnp.float32, -bound, bound)
        b = jax.random.uniform(kb, (1, fan_out), jnp.float32, -bound, bound)
        params.append((w, b))
    return params


def reference_forward(x, padded_params, out_dim):
    """Pure-JAX reference mirroring the kernel numerics (bf16 dot, f32 accum)."""
    B, _ = x.shape
    in_pad = padded_params[0][0].shape[0]
    h = _pad2d(x, B, in_pad)
    for i, (w, b) in enumerate(padded_params):
        h = jnp.dot(h.astype(jnp.bfloat16), w,
                    preferred_element_type=jnp.float32) + b
        h = _leaky_relu(h) if i < 3 else jnp.tanh(h)
    return h[:, :out_dim]


if __name__ == "__main__":
    batch = 256                      # two 128-row tiles -> exercises the grid
    noise_dim = 16
    hidden_dim = 32
    image_resolution = (1, 8, 8)     # prod = 64
    out_dim = int(math.prod(image_resolution))

    key = jax.random.PRNGKey(0)
    key, kx = jax.random.split(key)
    x = jax.random.normal(kx, (batch, noise_dim), dtype=jnp.float32)

    params = init_params(key, noise_dim, hidden_dim, out_dim)
    padded_params = pad_params(params)

    y = simple_generator(x, padded_params, out_dim)
    y = jax.block_until_ready(y)

    y_ref = reference_forward(x, padded_params, out_dim)
    assert y.shape == (batch, out_dim)
    max_err = float(jnp.max(jnp.abs(y - y_ref)))
    assert bool(jnp.allclose(y, y_ref, atol=2e-3, rtol=2e-3)), max_err

    print("KERNEL_OK")
</pallas_src>

<mosaic_0001>
module attributes {stable_mosaic.version = 11 : i64} {
  func.func @mlp_generator_kernel(%arg0: i32, %arg1: memref<128x128xbf16, #tpu.memory_space<vmem>>, %arg2: memref<128x128xbf16, #tpu.memory_space<vmem>>, %arg3: memref<1x128xf32, #tpu.memory_space<vmem>>, %arg4: memref<128x128xbf16, #tpu.memory_space<vmem>>, %arg5: memref<1x128xf32, #tpu.memory_space<vmem>>, %arg6: memref<128x128xbf16, #tpu.memory_space<vmem>>, %arg7: memref<1x128xf32, #tpu.memory_space<vmem>>, %arg8: memref<128x128xbf16, #tpu.memory_space<vmem>>, %arg9: memref<1x128xf32, #tpu.memory_space<vmem>>, %arg10: memref<128x128xf32, #tpu.memory_space<vmem>>) attributes {dimension_semantics = [#tpu.dimension_semantics<parallel>], iteration_bounds = array<i64: 2>, scalar_prefetch = 0 : i64, scratch_operands = 0 : i64, tpu.core_type = #tpu.core_type<tc>, window_params = [{transform_indices = @transform_0, window_bounds = array<i64: 128, 128>}, {pipeline_mode = #tpu.pipeline_mode<synchronous>, transform_indices = @transform_1, window_bounds = array<i64: 128, 128>}, {pipeline_mode = #tpu.pipeline_mode<synchronous>, transform_indices = @transform_2, window_bounds = array<i64: 1, 128>}, {pipeline_mode = #tpu.pipeline_mode<synchronous>, transform_indices = @transform_3, window_bounds = array<i64: 128, 128>}, {pipeline_mode = #tpu.pipeline_mode<synchronous>, transform_indices = @transform_4, window_bounds = array<i64: 1, 128>}, {pipeline_mode = #tpu.pipeline_mode<synchronous>, transform_indices = @transform_5, window_bounds = array<i64: 128, 128>}, {pipeline_mode = #tpu.pipeline_mode<synchronous>, transform_indices = @transform_6, window_bounds = array<i64: 1, 128>}, {pipeline_mode = #tpu.pipeline_mode<synchronous>, transform_indices = @transform_7, window_bounds = array<i64: 128, 128>}, {pipeline_mode = #tpu.pipeline_mode<synchronous>, transform_indices = @transform_8, window_bounds = array<i64: 1, 128>}, {transform_indices = @transform_9, window_bounds = array<i64: 128, 128>}]} {
    %c0 = arith.constant 0 : index
    %c0_0 = arith.constant 0 : index
    %0 = vector.load %arg1[%c0, %c0_0] : memref<128x128xbf16, #tpu.memory_space<vmem>>, vector<128x128xbf16>
    %c0_1 = arith.constant 0 : index
    %c0_2 = arith.constant 0 : index
    %1 = vector.load %arg2[%c0_1, %c0_2] : memref<128x128xbf16, #tpu.memory_space<vmem>>, vector<128x128xbf16>
    %cst = arith.constant dense<0.000000e+00> : vector<128x128xf32>
    %2 = tpu.matmul %0, %1, %cst {dimension_numbers = #tpu.dot_dimension_numbers<[1], [0], [0], [1], [0, 0, 1, 1], [], []>} : vector<128x128xbf16>, vector<128x128xbf16>, vector<128x128xf32> -> vector<128x128xf32>
    %c0_3 = arith.constant 0 : index
    %c0_4 = arith.constant 0 : index
    %3 = vector.load %arg3[%c0_3, %c0_4] : memref<1x128xf32, #tpu.memory_space<vmem>>, vector<1x128xf32>
    %4 = vector.broadcast %3 : vector<1x128xf32> to vector<128x128xf32>
    %5 = arith.addf %2, %4 : vector<128x128xf32>
    %cst_5 = arith.constant 0.000000e+00 : f32
    %6 = vector.broadcast %cst_5 : f32 to vector<128x128xf32>
    %7 = arith.cmpf oge, %5, %6 : vector<128x128xf32>
    %cst_6 = arith.constant 5.000000e-02 : f32
    %8 = vector.broadcast %cst_6 : f32 to vector<128x128xf32>
    %9 = arith.mulf %8, %5 : vector<128x128xf32>
    %10 = arith.select %7, %5, %9 : vector<128x128xi1>, vector<128x128xf32>
    %11 = arith.truncf %10 : vector<128x128xf32> to vector<128x128xbf16>
    %c0_7 = arith.constant 0 : index
    %c0_8 = arith.constant 0 : index
    %12 = vector.load %arg4[%c0_7, %c0_8] : memref<128x128xbf16, #tpu.memory_space<vmem>>, vector<128x128xbf16>
    %cst_9 = arith.constant dense<0.000000e+00> : vector<128x128xf32>
    %13 = tpu.matmul %11, %12, %cst_9 {dimension_numbers = #tpu.dot_dimension_numbers<[1], [0], [0], [1], [0, 0, 1, 1], [], []>} : vector<128x128xbf16>, vector<128x128xbf16>, vector<128x128xf32> -> vector<128x128xf32>
    %c0_10 = arith.constant 0 : index
    %c0_11 = arith.constant 0 : index
    %14 = vector.load %arg5[%c0_10, %c0_11] : memref<1x128xf32, #tpu.memory_space<vmem>>, vector<1x128xf32>
    %15 = vector.broadcast %14 : vector<1x128xf32> to vector<128x128xf32>
    %16 = arith.addf %13, %15 : vector<128x128xf32>
    %cst_12 = arith.constant 0.000000e+00 : f32
    %17 = vector.broadcast %cst_12 : f32 to vector<128x128xf32>
    %18 = arith.cmpf oge, %16, %17 : vector<128x128xf32>
    %cst_13 = arith.constant 5.000000e-02 : f32
    %19 = vector.broadcast %cst_13 : f32 to vector<128x128xf32>
    %20 = arith.mulf %19, %16 : vector<128x128xf32>
    %21 = arith.select %18, %16, %20 : vector<128x128xi1>, vector<128x128xf32>
    %22 = arith.truncf %21 : vector<128x128xf32> to vector<128x128xbf16>
    %c0_14 = arith.constant 0 : index
    %c0_15 = arith.constant 0 : index
    %23 = vector.load %arg6[%c0_14, %c0_15] : memref<128x128xbf16, #tpu.memory_space<vmem>>, vector<128x128xbf16>
    %cst_16 = arith.constant dense<0.000000e+00> : vector<128x128xf32>
    %24 = tpu.matmul %22, %23, %cst_16 {dimension_numbers = #tpu.dot_dimension_numbers<[1], [0], [0], [1], [0, 0, 1, 1], [], []>} : vector<128x128xbf16>, vector<128x128xbf16>, vector<128x128xf32> -> vector<128x128xf32>
    %c0_17 = arith.constant 0 : index
    %c0_18 = arith.constant 0 : index
    %25 = vector.load %arg7[%c0_17, %c0_18] : memref<1x128xf32, #tpu.memory_space<vmem>>, vector<1x128xf32>
    %26 = vector.broadcast %25 : vector<1x128xf32> to vector<128x128xf32>
    %27 = arith.addf %24, %26 : vector<128x128xf32>
    %cst_19 = arith.constant 0.000000e+00 : f32
    %28 = vector.broadcast %cst_19 : f32 to vector<128x128xf32>
    %29 = arith.cmpf oge, %27, %28 : vector<128x128xf32>
    %cst_20 = arith.constant 5.000000e-02 : f32
    %30 = vector.broadcast %cst_20 : f32 to vector<128x128xf32>
    %31 = arith.mulf %30, %27 : vector<128x128xf32>
    %32 = arith.select %29, %27, %31 : vector<128x128xi1>, vector<128x128xf32>
    %33 = arith.truncf %32 : vector<128x128xf32> to vector<128x128xbf16>
    %c0_21 = arith.constant 0 : index
    %c0_22 = arith.constant 0 : index
    %34 = vector.load %arg8[%c0_21, %c0_22] : memref<128x128xbf16, #tpu.memory_space<vmem>>, vector<128x128xbf16>
    %cst_23 = arith.constant dense<0.000000e+00> : vector<128x128xf32>
    %35 = tpu.matmul %33, %34, %cst_23 {dimension_numbers = #tpu.dot_dimension_numbers<[1], [0], [0], [1], [0, 0, 1, 1], [], []>} : vector<128x128xbf16>, vector<128x128xbf16>, vector<128x128xf32> -> vector<128x128xf32>
    %c0_24 = arith.constant 0 : index
    %c0_25 = arith.constant 0 : index
    %36 = vector.load %arg9[%c0_24, %c0_25] : memref<1x128xf32, #tpu.memory_space<vmem>>, vector<1x128xf32>
    %37 = vector.broadcast %36 : vector<1x128xf32> to vector<128x128xf32>
    %38 = arith.addf %35, %37 : vector<128x128xf32>
    %39 = math.tanh %38 : vector<128x128xf32>
    %c0_26 = arith.constant 0 : index
    %c0_27 = arith.constant 0 : index
    %40 = vector.load %arg10[%c0_26, %c0_27] : memref<128x128xf32, #tpu.memory_space<vmem>>, vector<128x128xf32>
    tpu.vector_store %arg10[%c0_26, %c0_27], %39 {strides = array<i32>} : memref<128x128xf32, #tpu.memory_space<vmem>>, vector<128x128xf32>,
    return
  }
  func.func @transform_0(%arg0: i32) -> (i32, i32) {
    %c0_i32 = arith.constant 0 : i32
    %c0_i32_0 = arith.constant 0 : i32
    return %arg0, %c0_i32 : i32, i32
  }
  func.func @transform_1(%arg0: i32) -> (i32, i32) {
    %c0_i32 = arith.constant 0 : i32
    %c0_i32_0 = arith.constant 0 : i32
    %c0_i32_1 = arith.constant 0 : i32
    return %c0_i32, %c0_i32_0 : i32, i32
  }
  func.func @transform_2(%arg0: i32) -> (i32, i32) {
    %c0_i32 = arith.constant 0 : i32
    %c0_i32_0 = arith.constant 0 : i32
    %c0_i32_1 = arith.constant 0 : i32
    return %c0_i32, %c0_i32_0 : i32, i32
  }
  func.func @transform_3(%arg0: i32) -> (i32, i32) {
    %c0_i32 = arith.constant 0 : i32
    %c0_i32_0 = arith.constant 0 : i32
    %c0_i32_1 = arith.constant 0 : i32
    return %c0_i32, %c0_i32_0 : i32, i32
  }
  func.func @transform_4(%arg0: i32) -> (i32, i32) {
    %c0_i32 = arith.constant 0 : i32
    %c0_i32_0 = arith.constant 0 : i32
    %c0_i32_1 = arith.constant 0 : i32
    return %c0_i32, %c0_i32_0 : i32, i32
  }
  func.func @transform_5(%arg0: i32) -> (i32, i32) {
    %c0_i32 = arith.constant 0 : i32
    %c0_i32_0 = arith.constant 0 : i32
    %c0_i32_1 = arith.constant 0 : i32
    return %c0_i32, %c0_i32_0 : i32, i32
  }
  func.func @transform_6(%arg0: i32) -> (i32, i32) {
    %c0_i32 = arith.constant 0 : i32
    %c0_i32_0 = arith.constant 0 : i32
    %c0_i32_1 = arith.constant 0 : i32
    return %c0_i32, %c0_i32_0 : i32, i32
  }
  func.func @transform_7(%arg0: i32) -> (i32, i32) {
    %c0_i32 = arith.constant 0 : i32
    %c0_i32_0 = arith.constant 0 : i32
    %c0_i32_1 = arith.constant 0 : i32
    return %c0_i32, %c0_i32_0 : i32, i32
  }
  func.func @transform_8(%arg0: i32) -> (i32, i32) {
    %c0_i32 = arith.constant 0 : i32
    %c0_i32_0 = arith.constant 0 : i32
    %c0_i32_1 = arith.constant 0 : i32
    return %c0_i32, %c0_i32_0 : i32, i32
  }
  func.func @transform_9(%arg0: i32) -> (i32, i32) {
    %c0_i32 = arith.constant 0 : i32
    %c0_i32_0 = arith.constant 0 : i32
    return %arg0, %c0_i32 : i32, i32
  }
}

</mosaic_0001>

<bundles_post_ra>
// kernel: tpu_custom_call.1
= control target key start
LH: loop header
LB: loop body
LE: loop exit
PB: predicated region body
PF: predicated region fallthrough
CT: control target
= control target key end

     0   :  { %s2580_s0 = inlined_call_operand.hbm [shape: bf16[256,128], index: 0, kind: input, shape index: {}]   ;;  %s2581_s1 = inlined_call_operand.hbm [shape: bf16[128,128], index: 1, kind: input, shape index: {}]   ;;  %s2582_s2 = inlined_call_operand.vmem [shape: f32[1,128], index: 2, kind: input, shape index: {}]   ;;  %s2583_s3 = inlined_call_operand.hbm [shape: bf16[128,128], index: 3, kind: input, shape index: {}]   ;;  %s2584_s4 = inlined_call_operand.vmem [shape: f32[1,128], index: 4, kind: input, shape index: {}]   ;;  %s2585_s5 = inlined_call_operand.hbm [shape: bf16[128,128], index: 5, kind: input, shape index: {}]   ;;  %s2586_s6 = inlined_call_operand.vmem [shape: f32[1,128], index: 6, kind: input, shape index: {}]   ;;  %s2587_s7 = inlined_call_operand.hbm [shape: bf16[128,128], index: 7, kind: input, shape index: {}]   ;;  %s2588_s8 = inlined_call_operand.vmem [shape: f32[1,128], index: 8, kind: input, shape index: {}]   ;;  %s2589_s9 = inlined_call_operand.hbm [shape: f32[256,128], index: 9, kind: output, shape index: {}]  }
   0x1   :  { %2596 = sst [smem:[#allocation18_spill]] %s2589_s9 }
   0x2   :  { %14 = vsyncpa [#allocation3], 0 }
   0x3   :  { %16 = vsyncpa [#allocation3 + $0x1], 0 }
   0x4   :  { %17 = vsyncpa [#allocation6], 0 }
   0x5   :  { %18 = vsyncpa [#allocation9], 0 }
   0x6   :  { %19 = vsyncpa [#allocation4], 0 }
   0x7   :  { %21 = vsyncpa [#allocation4 + $0x1], 0  ;;  %s2174_s30 = smov 0   ;;  %s2176_s10 = smov 0  }
   0x8   :  { %s2178_s11 = smov 0   ;;  %s2180_s12 = smov 0  }
   0x9 LB: > { %2597 = sst [smem:[#allocation16_spill]] %s2100_s30  ;;  %s2195_s13 = sadd.s32 4294967295, %s2112_s12   ;;  %s2112_s12 = sphi %s2180_s12, %s2621_s12   ;;  %s2108_s11 = sphi %s2178_s11, %s2620_s11   ;;  %s2104_s10 = sphi %s2176_s10, %s2619_s10   ;;  %s2100_s30 = sphi %s2174_s30, %s2618_s30  }
   0xa   : > { %s1473_s14 = sadd.s32 4294967294, %s2112_s12   ;;  %p47_p0 = scmp.ne.s32.totalorder %s2104_s10, %s2100_s30 }
   0xb   : > { %p2590_p1 = scmp.eq.s32.totalorder %s2195_s13, 0  ;;  %p245_p3 = scmp.eq.s32.totalorder %s1473_s14, 1 }
   0xc   : > { %p1474_p5 = scmp.ge.s32.totalorder %s2112_s12, 1  ;;  %p252_p7 = scmp.lt.s32.totalorder %s2112_s12, 3 }
   0xd   : > { %p2204_p4 = por %p2590_p1, %p47_p0  ;;  %p2209_p6 = por %p245_p3, %p47_p0 }
   0xe   : > { %p2214_p8 = pnand %p1474_p5, %p252_p7  ;;  %s2114_s18 = smov [#allocation5]  }
   0xf   : > { %s2598_s15 = scalar_select %p2204_p4, 1, 0 }
  0x10   : > { %s2599_s16 = scalar_select %p2209_p6, 1, 0 }
  0x11   : > { %s2601_s17 = scalar_select %p2214_p8, 1, 0 }
  0x12   : > { %2600 = sst [smem:[#allocation17_spill]] %s2599_s16  ;;  %s264_s19 = sshll.u32 %s2114_s18, 4  ;;  %s2218_s19 = int_to_ptr.vmem [resolvable:$true] %s264_s19 }
  0x13   : > { %p1753_p9 = pneg %p2214_p8  ;;  %s2115_s21 = smov [#allocation8]  }
  0x14   : > { %s296_s22 = sshll.u32 %s2115_s21, 4  ;;  %s2116_s23 = smov [#allocation7]   ;;  %s2229_s22 = int_to_ptr.vmem [resolvable:$true] %s296_s22 }
  0x15   : > { %p2225_p11 = pnand %p1753_p9, %p2590_p1  ;;  %s2231_s24 = sshll.u32 %s2116_s23, 4  ;;  %s281_s24 = int_to_ptr.vmem [resolvable:$true] %s2231_s24 }
  0x16   : > { %s1896_s27 = scalar_lea.hbm %s2581_s1, 1024 }
  0x17   : > { %p1897_p12 = scmp.ne.s32.totalorder %s2581_s1, %s1896_s27  ;;  %p2241_p13 = pneg %p2225_p11 }
  0x18   : > { %p1903_p5 = scmp.lt.u32.totalorder %s1896_s27, %s2581_s1 }
  0x19   : > { %p1899_p0 = pnand %p2241_p13, %p1897_p12 }
  0x1b   : > { %p1900_p3 = pneg %p1899_p0 }
  0x1d   : > { %p1905_p7 = pnand %p1903_p5, %p1900_p3 }
  0x1f   : > { %1908 = shalt.err (!%p1905_p7)
}
  0x20   : > { %s1909_s23 = scalar_lea.vmem %s2218_s19, 1024  ;;  %p1917_p2 = scmp.lt.s32.totalorder %s2218_s19, %s2218_s19 }
  0x21   : > { %p1910_p9 = scmp.ne.s32.totalorder %s2218_s19, %s1909_s23  ;;  %p1918_p6 = scmp.lt.s32.totalorder %s1909_s23, %s1909_s23 }
  0x23   : > { %p1912_p10 = pnand %p1910_p9, %p2241_p13  ;;  %p1919_p12 = por %p1918_p6, %p1917_p2 }
  0x25   : > { %p1913_p1 = pneg %p1912_p10 }
  0x27   : > { %p1920_p0 = pnand %p1919_p12, %p1913_p1 }
  0x29   : > { %1923 = shalt.err (!%p1920_p0)
}
  0x2a   : > { %s2117_s25 = smov 64   ;;  %s2118_s26 = smov 4  }
  0x2b   : > { %1756 = dma.hbm_to_vmem [thread:$0]  (!%p2225_p11), %s2581_s1, 1024, %s2218_s19, [#allocation6], %s2117_s25, %s2117_s25, %s2118_s26  }
  0x2c   : > { %s1924_s21 = scalar_lea.hbm %s2585_s5, 1024 }
  0x2d   : > { %p1925_p1 = scmp.ne.s32.totalorder %s2585_s5, %s1924_s21  ;;  %p1931_p10 = scmp.lt.u32.totalorder %s1924_s21, %s2585_s5 }
  0x2f   : > { %p1927_p2 = pnand %p1925_p1, %p2241_p13 }
  0x31   : > { %p1928_p6 = pneg %p1927_p2 }
  0x33   : > { %p1933_p3 = pnand %p1931_p10, %p1928_p6 }
  0x35   : > { %1936 = shalt.err (!%p1933_p3)
}
  0x36   : > { %s1937_s19 = scalar_lea.vmem %s2229_s22, 1024  ;;  %p1945_p12 = scmp.lt.s32.totalorder %s2229_s22, %s2229_s22 }
  0x37   : > { %p1938_p5 = scmp.ne.s32.totalorder %s2229_s22, %s1937_s19  ;;  %p1946_p0 = scmp.lt.s32.totalorder %s1937_s19, %s1937_s19 }
  0x39   : > { %p1940_p7 = pnand %p1938_p5, %p2241_p13  ;;  %p1947_p1 = por %p1946_p0, %p1945_p12 }
  0x3b   : > { %p1941_p9 = pneg %p1940_p7 }
  0x3d   : > { %p1948_p2 = pnand %p1947_p1, %p1941_p9 }
  0x3f   : > { %1951 = shalt.err (!%p1948_p2)
}
  0x40   : > { %1762 = dma.hbm_to_vmem [thread:$0]  (!%p2225_p11), %s2585_s5, 1024, %s2229_s22, [#allocation9], %s2117_s25, %s2117_s25, %s2118_s26  }
  0x41   : > { %s1952_s28 = scalar_lea.hbm %s2583_s3, 1024 }
  0x42   : > { %p1953_p6 = scmp.ne.s32.totalorder %s2583_s3, %s1952_s28  ;;  %p1959_p5 = scmp.lt.u32.totalorder %s1952_s28, %s2583_s3 }
  0x44   : > { %p1955_p10 = pnand %p1953_p6, %p2241_p13 }
  0x46   : > { %p1956_p3 = pneg %p1955_p10 }
  0x48   : > { %p1961_p7 = pnand %p1959_p5, %p1956_p3 }
  0x4a   : > { %1964 = shalt.err (!%p1961_p7)
}
  0x4b   : > { %s1965_s19 = scalar_lea.vmem %s281_s24, 1024  ;;  %p1973_p1 = scmp.lt.s32.totalorder %s281_s24, %s281_s24 }
  0x4c   : > { %p1966_p9 = scmp.ne.s32.totalorder %s281_s24, %s1965_s19  ;;  %p1974_p2 = scmp.lt.s32.totalorder %s1965_s19, %s1965_s19 }
  0x4e   : > { %p1968_p12 = pnand %p1966_p9, %p2241_p13  ;;  %p1975_p4 = por %p1974_p2, %p1973_p1 }
  0x50   : > { %p1969_p0 = pneg %p1968_p12 }
  0x52   : > { %p1976_p8 = pnand %p1975_p4, %p1969_p0 }
  0x54   : > { %1979 = shalt.err (!%p1976_p8)
}
  0x55   : > { %1759 = dma.hbm_to_vmem [thread:$0]  (!%p2225_p11), %s2583_s3, 1024, %s281_s24, [#allocation6], %s2117_s25, %s2117_s25, %s2118_s26  }
  0x56   : > { %s2119_s30 = smov [#allocation10]   ;;  %s1980_s29 = scalar_lea.hbm %s2587_s7, 1024 }
  0x57   : > { %s312_s16 = sshll.u32 %s2119_s30, 4  ;;  %p1981_p4 = scmp.ne.s32.totalorder %s2587_s7, %s1980_s29  ;;  %s313_s16 = int_to_ptr.vmem [resolvable:$true] %s312_s16 }
  0x58   : > { %p1987_p10 = scmp.lt.u32.totalorder %s1980_s29, %s2587_s7 }
  0x59   : > { %p1983_p8 = pnand %p1981_p4, %p2241_p13 }
  0x5b   : > { %p1984_p6 = pneg %p1983_p8 }
  0x5d   : > { %p1989_p3 = pnand %p1987_p10, %p1984_p6 }
  0x5f   : > { %1992 = shalt.err (!%p1989_p3)
}
  0x60   : > { %s1993_s24 = scalar_lea.vmem %s313_s16, 1024  ;;  %p2001_p12 = scmp.lt.s32.totalorder %s313_s16, %s313_s16 }
  0x61   : > { %p1994_p5 = scmp.ne.s32.totalorder %s313_s16, %s1993_s24  ;;  %p2002_p0 = scmp.lt.s32.totalorder %s1993_s24, %s1993_s24 }
  0x63   : > { %p1996_p7 = pnand %p1994_p5, %p2241_p13  ;;  %p2003_p1 = por %p2002_p0, %p2001_p12 }
  0x65   : > { %p1997_p9 = pneg %p1996_p7 }
  0x67   : > { %p2004_p2 = pnand %p2003_p1, %p1997_p9 }
  0x69   : > { %2007 = shalt.err (!%p2004_p2)
}
  0x6a   : > { %1765 = dma.hbm_to_vmem [thread:$0]  (!%p2225_p11), %s2587_s7, 1024, %s313_s16, [#allocation9], %s2117_s25, %s2117_s25, %s2118_s26  }
  0x6b   : > { %s2335_s14 = sadd.s32 1, %s2112_s12   ;;  %s34_s20 = sadd.s32 1, %s2108_s11 }
  0x6c   : > { %s31_s30 = ssub.s32 %s2112_s12, %s2335_s14  ;;  %p41_p13 = scmp.ne.s32.totalorder %s2108_s11, %s2104_s10 }
  0x6d   : > { %p32_p4 = scmp.eq.s32.totalorder %s31_s30, 0  ;;  %p42_p8 = scmp.eq.s32.totalorder %s2112_s12, 0 }
  0x6e   : > { %p2604_p6 = scmp.eq.s32.totalorder %s2195_s13, 1  ;;  %p1778_p3 = scmp.lt.s32.totalorder %s2112_s12, 2 }
  0x6f   : > { %s2351_s28 = scalar_select %p32_p4, %s2108_s11, %s34_s20  }
  0x70   : > { %p2345_p10 = por %p2604_p6, %p41_p13  ;;  %p43_p5 = por %p42_p8, %p41_p13 }
  0x71   : > { %s329_s29 = sand.u32 1, %s2108_s11   ;;  %s1539_s16 = sshll.u32 %s2112_s12, 10 }
  0x72   : > { %s1480_s18 = sshll.u32 %s329_s29, 6  ;;  %s2358_s19 = scalar_lea.hbm %s2580_s0, %s1539_s16 }
  0x73   : > { %s333_s24 = scalar_lea.vmem [#allocation2], %s1480_s18  ;;  %p2362_p11 = pnand %p1778_p3, %p43_p5 }
  0x74   : > { %s340_s22 = sshll.u32 %s333_s24, 4  ;;  %s2366_s20 = scalar_lea.sflag [#allocation3], %s329_s29  ;;  %s2360_s22 = int_to_ptr.vmem [resolvable:$true] %s340_s22 }
  0x75   : > { %s2008_s30 = scalar_lea.hbm %s2358_s19, 1024  ;;  %p2010_p9 = pneg %p2362_p11 }
  0x76   : > { %p2009_p7 = scmp.ne.s32.totalorder %s2358_s19, %s2008_s30  ;;  %s2013_s21 = scalar_lea.hbm %s2580_s0, 2048 }
  0x77   : > { %p2014_p1 = scmp.lt.u32.totalorder %s2358_s19, %s2580_s0  ;;  %p2015_p2 = scmp.lt.u32.totalorder %s2013_s21, %s2008_s30 }
  0x78   : > { %p2011_p12 = pnand %p2010_p9, %p2009_p7  ;;  %p2017_p4 = scmp.lt.u32.totalorder %s2008_s30, %s2358_s19 }
  0x79   : > { %p2016_p13 = por %p2015_p2, %p2014_p1 }
  0x7a   : > { %p2012_p0 = pneg %p2011_p12 }
  0x7b   : > { %p2018_p8 = por %p2017_p4, %p2016_p13 }
  0x7d   : > { %p2019_p6 = pnand %p2018_p8, %p2012_p0 }
  0x7f   : > { %2022 = shalt.err (!%p2019_p6)
}
  0x80   : > { %s2023_s29 = scalar_lea.vmem %s2360_s22, 1024  ;;  %s2120_s18 = smov [#allocation2]  }
  0x81   : > { %p2024_p3 = scmp.ne.s32.totalorder %s2360_s22, %s2023_s29  ;;  %s2028_s16 = sshll.u32 %s2120_s18, 4  ;;  %s2029_s16 = int_to_ptr.vmem [resolvable:$false] %s2028_s16 }
  0x82   : > { %s2030_s23 = scalar_lea.vmem %s2029_s16, 2048  ;;  %p2031_p12 = scmp.lt.s32.totalorder %s2360_s22, %s2029_s16 }
  0x83   : > { %p2026_p5 = pnand %p2024_p3, %p2010_p9  ;;  %p2032_p1 = scmp.lt.s32.totalorder %s2030_s23, %s2023_s29 }
  0x85   : > { %p2027_p7 = pneg %p2026_p5  ;;  %p2033_p2 = por %p2032_p1, %p2031_p12 }
  0x87   : > { %p2034_p13 = pnand %p2033_p2, %p2027_p7 }
  0x89   : > { %2037 = shalt.err (!%p2034_p13)
}
  0x8a   : > { %1769 = dma.hbm_to_vmem [thread:$0]  (!%p2362_p11), %s2358_s19, 1024, %s2360_s22, %s2366_s20, %s2117_s25, %s2117_s25, %s2118_s26  }
  0x8b   : > { %p2607_p9 = scmp.ne.s32.totalorder %s2601_s17, 0 }
  0x8c   : > { %s2400_s30 = sand.u32 (!%p2607_p9), 1, %s2104_s10   ;;  %p2608_p0 = scmp.ne.s32.totalorder (!%p2607_p9), %s2598_s15, 0 }
  0x8d   : > { %352 = sbr.rel (%p2607_p9) target bundleno = 1125 (0x465), region = 56  ;;  %s1484_s21 = sshll.u32 (!%p2607_p9), %s2400_s30, 6 }
  0x8e   : > { %s355_s24 = scalar_lea.sflag (!%p2607_p9), [#allocation3], %s2400_s30  ;;  %s2404_s29 = scalar_lea.vmem (!%p2607_p9), [#allocation2], %s1484_s21 }
  0x94   : > { %2083 = dma.done.wait (%p2608_p0), %s355_s24, 1024  }
  0x95   : > { %2085 = vsyncadd (%p2608_p0), %s355_s24, 4294966272  ;;  %p2609_p11 = scmp.eq.s32.totalorder %s2195_s13, 0 }
  0x97   : > { %2087 = dma.done.wait (%p2609_p11), [#allocation6], 2048   ;;  %p2610_p4 = pmov %p2609_p11 }
  0x99   : > { %2089 = vsyncadd (%p2610_p4), [#allocation6], 4294965248  ;;  %p2611_p8 = pmov %p2610_p4 }
  0x9a   : > { %p2612_p6 = pmov %p2610_p4 }
  0x9b   : > { %2091 = dma.done.wait (%p2611_p8), [#allocation9], 2048  }
  0x9c   : > { %2093 = vsyncadd (%p2612_p6), [#allocation9], 4294965248  ;;  %v1824_v0 = vld [vmem:[#allocation5] sm:$0xff]   ;;  %v1825_v1 = vld [vmem:[#allocation5 + $0x8] sm:$0xff]   ;;  %s1489_s18 = sshll.u32 %s2400_s30, 7  ;;  %s1540_s23 = sshll.u32 %s2195_s13, 11 }
  0x9d   : > { %1605 = vmatprep.subr.bf16.mxu0 %v1824_v0  ;;  %v1826_v2 = vld [vmem:[#allocation5 + $0x10] sm:$0xff]   ;;  %v1827_v3 = vld [vmem:[#allocation5 + $0x18] sm:$0xff]   ;;  %v1832_v4 = vld [vmem:[%s2404_s29] sm:$0xff]   ;;  %s2503_s16 = scalar_lea.vmem [#allocation11], %s1489_s18  ;;  %s2613_s15 = sld [smem:[#allocation18_spill]] }
  0x9e   : > { %1606 = vmatpush3.bf16.msra.mxu0 %v1824_v0  ;;  %1621 = vmatprep.mubr.bf16.mxu0 %v1832_v4  ;;  %v1828_v5 = vld [vmem:[#allocation5 + $0x20] sm:$0xff]   ;;  %v1829_v6 = vld [vmem:[#allocation5 + $0x28] sm:$0xff]   ;;  %v1830_v9 = vld [vmem:[#allocation5 + $0x30] sm:$0xff]   ;;  %s1362_s21 = sshll.u32 %s2503_s16, 4  ;;  %s1349_s13 = scalar_lea.sflag [#allocation4], %s2400_s30  ;;  %s2533_s21 = int_to_ptr.vmem [resolvable:$true] %s1362_s21 }
  0x9f   : > { %1607 = vmatprep.subr.bf16.mxu0 %v1825_v1  ;;  %v1840_v7 = vld [vmem:[#allocation7] sm:$0xff]   ;;  %v1841_v8 = vld [vmem:[#allocation7 + $0x8] sm:$0xff]   ;;  %v1842_v10 = vld [vmem:[#allocation7 + $0x10] sm:$0xff]   ;;  %s2038_s25 = scalar_lea.vmem %s2533_s21, 2048  ;;  %s2121_s26 = smov [#allocation11]  }
  0xa0   : > { %1637 = vmatprep.subr.bf16.mxu1 %v1840_v7  ;;  %v1831_v11 = vld [vmem:[#allocation5 + $0x38] sm:$0xff]   ;;  %v1844_v13 = vld [vmem:[#allocation7 + $0x20] sm:$0xff]   ;;  %v1833_v14 = vld [vmem:[%s2404_s29 + $0x8] sm:$0xff]   ;;  %p2039_p3 = scmp.ne.s32.totalorder %s2533_s21, %s2038_s25  ;;  %s2042_s19 = sshll.u32 %s2121_s26, 4  ;;  %s2043_s19 = int_to_ptr.vmem [resolvable:$false] %s2042_s19 }
  0xa1   : > { %1638 = vmatpush3.bf16.msra.mxu1 %v1840_v7  ;;  %v1843_v12 = vld [vmem:[#allocation7 + $0x18] sm:$0xff]   ;;  %v1834_v15 = vld [vmem:[%s2404_s29 + $0x10] sm:$0xff]   ;;  %v1836_v17 = vld [vmem:[%s2404_s29 + $0x20] sm:$0xff]   ;;  %s2044_s22 = scalar_lea.vmem %s2043_s19, 4096  ;;  %p2045_p12 = scmp.lt.s32.totalorder %s2533_s21, %s2043_s19 }
  0xa2   : > { %1608 = vmatpush3.bf16.msra.mxu0 %v1825_v1  ;;  %1639 = vmatprep.subr.bf16.mxu1 %v1841_v8  ;;  %v1835_v16 = vld [vmem:[%s2404_s29 + $0x18] sm:$0xff]   ;;  %v1837_v18 = vld [vmem:[%s2404_s29 + $0x28] sm:$0xff]   ;;  %v1838_v19 = vld [vmem:[%s2404_s29 + $0x30] sm:$0xff]   ;;  %p2040_p5 = pnand %p2039_p3, %p2345_p10  ;;  %p2046_p1 = scmp.lt.s32.totalorder %s2044_s22, %s2038_s25 }
  0xa3   : > { %1609 = vmatprep.subr.bf16.mxu0 %v1826_v2  ;;  %v1839_v20 = vld [vmem:[%s2404_s29 + $0x38] sm:$0xff]   ;;  %v1845_v21 = vld [vmem:[#allocation7 + $0x28] sm:$0xff]   ;;  %v1846_v22 = vld [vmem:[#allocation7 + $0x30] sm:$0xff]   ;;  %s2531_s17 = scalar_lea.hbm %s2613_s15, %s1540_s23 }
  0xa4   : > { %v1847_v23 = vld [vmem:[#allocation7 + $0x38] sm:$0xff]   ;;  %v1848_v24 = vld [vmem:[#allocation8] sm:$0xff]   ;;  %v1849_v25 = vld [vmem:[#allocation8 + $0x8] sm:$0xff]   ;;  %p2041_p7 = pneg %p2040_p5  ;;  %p2047_p2 = por %p2046_p1, %p2045_p12 }
  0xa5   : > { %1640 = vmatpush3.bf16.msra.mxu1 %v1841_v8  ;;  %v1850_v26 = vld [vmem:[#allocation8 + $0x10] sm:$0xff]   ;;  %v1851_v27 = vld [vmem:[#allocation8 + $0x18] sm:$0xff]   ;;  %v1852_v28 = vld [vmem:[#allocation8 + $0x20] sm:$0xff]  }
  0xa6   : > { %1610 = vmatpush3.bf16.msra.mxu0 %v1826_v2  ;;  %1641 = vmatprep.subr.bf16.mxu1 %v1842_v10  ;;  %v1853_v29 = vld [vmem:[#allocation8 + $0x28] sm:$0xff]   ;;  %v2429_v30 = vld [vmem:[%s2582_s2] ss:$0 sm:$0xff]  ;;  %p2048_p13 = pnand %p2047_p2, %p2041_p7 }
  0xa7   : > { %1611 = vmatprep.subr.bf16.mxu0 %v1827_v3 }
  0xa9   : > { %1642 = vmatpush3.bf16.msra.mxu1 %v1842_v10 }
  0xaa   : > { %1612 = vmatpush3.bf16.msra.mxu0 %v1827_v3  ;;  %1643 = vmatprep.subr.bf16.mxu1 %v1843_v12 }
  0xab   : > { %1613 = vmatprep.subr.bf16.mxu0 %v1828_v5 }
  0xad   : > { %1644 = vmatpush3.bf16.msra.mxu1 %v1843_v12 }
  0xae   : > { %1614 = vmatpush3.bf16.msra.mxu0 %v1828_v5  ;;  %1645 = vmatprep.subr.bf16.mxu1 %v1844_v13 }
  0xaf   : > { %1615 = vmatprep.subr.bf16.mxu0 %v1829_v6 }
  0xb1   : > { %1646 = vmatpush3.bf16.msra.mxu1 %v1844_v13 }
  0xb2   : > { %1616 = vmatpush3.bf16.msra.mxu0 %v1829_v6  ;;  %1647 = vmatprep.subr.bf16.mxu1 %v1845_v21 }
  0xb3   : > { %1617 = vmatprep.subr.bf16.mxu0 %v1830_v9 }
  0xb5   : > { %1648 = vmatpush3.bf16.msra.mxu1 %v1845_v21 }
  0xb6   : > { %1618 = vmatpush3.bf16.msra.mxu0 %v1830_v9  ;;  %1649 = vmatprep.subr.bf16.mxu1 %v1846_v22 }
  0xb7   : > { %1619 = vmatprep.subr.bf16.mxu0 %v1831_v11 }
  0xb9   : > { %1650 = vmatpush3.bf16.msra.mxu1 %v1846_v22 }
  0xba   : > { %1620 = vmatpush3.bf16.msra.mxu0 %v1831_v11  ;;  %1651 = vmatprep.subr.bf16.mxu1 %v1847_v23 }
  0xbb   : > { %1669 = vmatprep.subr.bf16.mxu0 %v1848_v24 }
  0xbd   : > { %1622 = vmatmul.mubr.bf16.vlgmr.msra.gmra.mrb[0].mxu0 %v1833_v14  ;;  %1652 = vmatpush3.bf16.msra.mxu1 %v1847_v23 }
  0xbe   : > { %1625 = vmatprep.mubr.bf16.mxu0 %v1834_v15  ;;  %1670 = vmatpush3.bf16.msra.mxu0 %v1848_v24 }
  0xbf   : > { %1671 = vmatprep.subr.bf16.mxu0 %v1849_v25 }
  0xc2   : > { %1672 = vmatpush3.bf16.msra.mxu0 %v1849_v25 }
  0xc3   : > { %1673 = vmatprep.subr.bf16.mxu0 %v1850_v26 }
  0xc5   : > { %1626 = vmatmul.mubr.bf16.gmra.mrb[4].mxu0 %v1835_v16 }
  0xc6   : > { %1629 = vmatprep.mubr.bf16.mxu0 %v1836_v17  ;;  %1674 = vmatpush3.bf16.msra.mxu0 %v1850_v26 }
  0xc7   : > { %1675 = vmatprep.subr.bf16.mxu0 %v1851_v27 }
  0xca   : > { %1676 = vmatpush3.bf16.msra.mxu0 %v1851_v27 }
  0xcb   : > { %1677 = vmatprep.subr.bf16.mxu0 %v1852_v28 }
  0xcd   : > { %1630 = vmatmul.mubr.bf16.gmra.mrb[8].mxu0 %v1837_v18 }
  0xce   : > { %1633 = vmatprep.mubr.bf16.mxu0 %v1838_v19  ;;  %1678 = vmatpush3.bf16.msra.mxu0 %v1852_v28 }
  0xcf   : > { %1679 = vmatprep.subr.bf16.mxu0 %v1853_v29 }
  0xd2   : > { %1680 = vmatpush3.bf16.msra.mxu0 %v1853_v29 }
  0xd5   : > { %1634 = vmatmul.mubr.bf16.gmra.mrb[12].mxu0 %v1839_v20 }
 0x190   : > { %v1623_v31 = vpop.f32.mrb[0].mxu0 }
 0x191   : > { %v590_v32 = vadd.f32 %v1623_v31, %v2429_v30  ;;  %v581_v33 = vpop.f32.mrb[1].mxu0 }
 0x192   : > { %v582_v34 = vadd.f32 %v2429_v30, %v581_v33  ;;  %v1624_v35 = vpop.f32.mrb[2].mxu0 }
 0x193   : > { %v662_v36 = vmul.f32 0.05, %v590_v32  ;;  %v593_v37 = vadd.f32 %v1624_v35, %v2429_v30  ;;  %v584_v38 = vpop.f32.mrb[3].mxu0  ;;  %vm646_vm0 = vcmp.ge.f32.partialorder %v590_v32, 0.0 }
 0x194   : > { %v660_v39 = vmul.f32 0.05, %v582_v34  ;;  %v585_v40 = vadd.f32 %v2429_v30, %v584_v38  ;;  %vm644_vm2 = vcmp.ge.f32.partialorder %v582_v34, 0.0 }
 0x195   : > { %vm647_vm1 = vcmp.ge.f32.partialorder %v593_v37, 0.0  ;;  %v663_v41 = vmul.f32 0.05, %v593_v37  ;;  %v678_v43 = vsel %vm646_vm0, %v590_v32, %v662_v36 }
 0x196   : > { %v661_v42 = vmul.f32 0.05, %v585_v40  ;;  %vm645_vm3 = vcmp.ge.f32.partialorder %v585_v40, 0.0  ;;  %v676_v46 = vsel %vm644_vm2, %v582_v34, %v660_v39 }
 0x197   : > { %v679_v44 = vsel %vm647_vm1, %v593_v37, %v663_v41  ;;  %v1855_v41 = vld [vmem:[#allocation8 + $0x38] sm:$0xff]  }
 0x198   : > { %v1627_v45 = vpop.f32.mrb[4].mxu0  ;;  %v677_v47 = vsel %vm645_vm3, %v585_v40, %v661_v42  ;;  %v693_v48 = vpack.c.bf16 %v679_v44, %v678_v43  ;;  %v1854_v40 = vld [vmem:[#allocation8 + $0x30] sm:$0xff]   ;;  %v1857_v42 = vld [vmem:[#allocation10 + $0x8] sm:$0xff]   ;;  %v1859_v44 = vld [vmem:[#allocation10 + $0x18] sm:$0xff]  }
 0x199   : > { %v606_v49 = vadd.f32 %v1627_v45, %v2429_v30  ;;  %v597_v50 = vpop.f32.mrb[5].mxu0  ;;  %v692_v51 = vpack.c.bf16 %v677_v47, %v676_v46  ;;  %1681 = vmatprep.subr.bf16.mxu0 %v1854_v40  ;;  %v1858_v43 = vld [vmem:[#allocation10 + $0x10] sm:$0xff]   ;;  %v1860_v45 = vld [vmem:[#allocation10 + $0x20] sm:$0xff]   ;;  %v1861_v46 = vld [vmem:[#allocation10 + $0x28] sm:$0xff]  }
 0x19a   : > { %v598_v52 = vadd.f32 %v2429_v30, %v597_v50  ;;  %v1628_v53 = vpop.f32.mrb[6].mxu0  ;;  %1682 = vmatpush3.bf16.msra.mxu0 %v1854_v40  ;;  %v2450_v47 = vld [vmem:[%s2584_s4] ss:$0 sm:$0xff] }
 0x19b   : > { %v666_v54 = vmul.f32 0.05, %v606_v49  ;;  %v609_v55 = vadd.f32 %v1628_v53, %v2429_v30  ;;  %v600_v56 = vpop.f32.mrb[7].mxu0  ;;  %1653 = vmatprep.mubr.bf16.mxu1 %v692_v51  ;;  %vm650_vm4 = vcmp.ge.f32.partialorder %v606_v49, 0.0  ;;  %1683 = vmatprep.subr.bf16.mxu0 %v1855_v41 }
 0x19c   : > { %v664_v57 = vmul.f32 0.05, %v598_v52  ;;  %v601_v58 = vadd.f32 %v2429_v30, %v600_v56  ;;  %1654 = vmatmul.mubr.bf16.vlgmr.msra.gmra.mrb[0].mxu1 %v693_v48  ;;  %vm648_vm5 = vcmp.ge.f32.partialorder %v598_v52, 0.0 }
 0x19d   : > { %vm651_vm6 = vcmp.ge.f32.partialorder %v609_v55, 0.0  ;;  %v667_v59 = vmul.f32 0.05, %v609_v55  ;;  %v682_v61 = vsel %vm650_vm4, %v606_v49, %v666_v54 }
 0x19e   : > { %vm649_vm7 = vcmp.ge.f32.partialorder %v601_v58, 0.0  ;;  %v665_v60 = vmul.f32 0.05, %v601_v58  ;;  %v680_v0 = vsel %vm648_vm5, %v598_v52, %v664_v57  ;;  %1684 = vmatpush3.bf16.msra.mxu0 %v1855_v41 }
 0x19f   : > { %v683_v62 = vsel %vm651_vm6, %v609_v55, %v667_v59 }
 0x1a0   : > { %v1631_v63 = vpop.f32.mrb[8].mxu0  ;;  %v681_v1 = vsel %vm649_vm7, %v601_v58, %v665_v60  ;;  %v695_v2 = vpack.c.bf16 %v683_v62, %v682_v61 }
 0x1a1   : > { %v622_v3 = vadd.f32 %v1631_v63, %v2429_v30  ;;  %v613_v4 = vpop.f32.mrb[9].mxu0  ;;  %v694_v5 = vpack.c.bf16 %v681_v1, %v680_v0 }
 0x1a2   : > { %v614_v6 = vadd.f32 %v2429_v30, %v613_v4  ;;  %v1632_v7 = vpop.f32.mrb[10].mxu0 }
 0x1a3   : > { %v670_v8 = vmul.f32 0.05, %v622_v3  ;;  %v625_v9 = vadd.f32 %v1632_v7, %v2429_v30  ;;  %v616_v10 = vpop.f32.mrb[11].mxu0  ;;  %1657 = vmatprep.mubr.bf16.mxu1 %v694_v5  ;;  %vm654_vm8 = vcmp.ge.f32.partialorder %v622_v3, 0.0 }
 0x1a4   : > { %v668_v11 = vmul.f32 0.05, %v614_v6  ;;  %v617_v12 = vadd.f32 %v2429_v30, %v616_v10  ;;  %1658 = vmatmul.mubr.bf16.gmra.mrb[4].mxu1 %v695_v2  ;;  %vm652_vm9 = vcmp.ge.f32.partialorder %v614_v6, 0.0 }
 0x1a5   : > { %vm655_vm10 = vcmp.ge.f32.partialorder %v625_v9, 0.0  ;;  %v671_v13 = vmul.f32 0.05, %v625_v9  ;;  %v686_v15 = vsel %vm654_vm8, %v622_v3, %v670_v8 }
 0x1a6   : > { %vm653_vm11 = vcmp.ge.f32.partialorder %v617_v12, 0.0  ;;  %v669_v14 = vmul.f32 0.05, %v617_v12  ;;  %v684_v18 = vsel %vm652_vm9, %v614_v6, %v668_v11 }
 0x1a7   : > { %v687_v16 = vsel %vm655_vm10, %v625_v9, %v671_v13 }
 0x1a8   : > { %v1635_v17 = vpop.f32.mrb[12].mxu0  ;;  %v685_v19 = vsel %vm653_vm11, %v617_v12, %v669_v14  ;;  %v697_v20 = vpack.c.bf16 %v687_v16, %v686_v15 }
 0x1a9   : > { %v638_v21 = vadd.f32 %v1635_v17, %v2429_v30  ;;  %v629_v22 = vpop.f32.mrb[13].mxu0  ;;  %v696_v23 = vpack.c.bf16 %v685_v19, %v684_v18 }
 0x1aa   : > { %v630_v24 = vadd.f32 %v2429_v30, %v629_v22  ;;  %v1636_v25 = vpop.f32.mrb[14].mxu0 }
 0x1ab   : > { %v674_v26 = vmul.f32 0.05, %v638_v21  ;;  %v641_v27 = vadd.f32 %v1636_v25, %v2429_v30  ;;  %v632_v28 = vpop.f32.mrb[15].mxu0  ;;  %1661 = vmatprep.mubr.bf16.mxu1 %v696_v23  ;;  %vm658_vm12 = vcmp.ge.f32.partialorder %v638_v21, 0.0 }
 0x1ac   : > { %v672_v29 = vmul.f32 0.05, %v630_v24  ;;  %v633_v31 = vadd.f32 %v2429_v30, %v632_v28  ;;  %1662 = vmatmul.mubr.bf16.gmra.mrb[8].mxu1 %v697_v20  ;;  %vm656_vm13 = vcmp.ge.f32.partialorder %v630_v24, 0.0  ;;  %v1856_v30 = vld [vmem:[#allocation10] sm:$0xff]  }
 0x1ad   : > { %vm659_vm14 = vcmp.ge.f32.partialorder %v641_v27, 0.0  ;;  %v675_v32 = vmul.f32 0.05, %v641_v27  ;;  %v690_v34 = vsel %vm658_vm12, %v638_v21, %v674_v26  ;;  %1701 = vmatprep.subr.bf16.mxu1 %v1856_v30 }
 0x1ae   : > { %vm657_vm15 = vcmp.ge.f32.partialorder %v633_v31, 0.0  ;;  %v673_v33 = vmul.f32 0.05, %v633_v31  ;;  %v688_v36 = vsel %vm656_vm13, %v630_v24, %v672_v29  ;;  %1702 = vmatpush3.bf16.msra.mxu1 %v1856_v30 }
 0x1af   : > { %v691_v35 = vsel %vm659_vm14, %v641_v27, %v675_v32  ;;  %1703 = vmatprep.subr.bf16.mxu1 %v1857_v42 }
 0x1b0   : > { %v689_v37 = vsel %vm657_vm15, %v633_v31, %v673_v33  ;;  %v699_v38 = vpack.c.bf16 %v691_v35, %v690_v34 }
 0x1b1   : > { %v698_v39 = vpack.c.bf16 %v689_v37, %v688_v36 }
 0x1b2   : > { %1704 = vmatpush3.bf16.msra.mxu1 %v1857_v42 }
 0x1b3   : > { %1665 = vmatprep.mubr.bf16.mxu1 %v698_v39  ;;  %1705 = vmatprep.subr.bf16.mxu1 %v1858_v43 }
 0x1b4   : > { %1666 = vmatmul.mubr.bf16.gmra.mrb[12].mxu1 %v699_v38 }
 0x1b6   : > { %1706 = vmatpush3.bf16.msra.mxu1 %v1858_v43 }
 0x1b7   : > { %1707 = vmatprep.subr.bf16.mxu1 %v1859_v44 }
 0x1ba   : > { %1708 = vmatpush3.bf16.msra.mxu1 %v1859_v44 }
 0x1bb   : > { %1709 = vmatprep.subr.bf16.mxu1 %v1860_v45 }
 0x1be   : > { %1710 = vmatpush3.bf16.msra.mxu1 %v1860_v45 }
 0x1bf   : > { %1711 = vmatprep.subr.bf16.mxu1 %v1861_v46 }
 0x1c2   : > { %1712 = vmatpush3.bf16.msra.mxu1 %v1861_v46 }
 0x26f   : > { %v1655_v48 = vpop.f32.mrb[0].mxu1 }
 0x270   : > { %v814_v49 = vadd.f32 %v1655_v48, %v2450_v47  ;;  %v805_v50 = vpop.f32.mrb[1].mxu1 }
 0x271   : > { %v806_v51 = vadd.f32 %v2450_v47, %v805_v50  ;;  %v1656_v52 = vpop.f32.mrb[2].mxu1 }
 0x272   : > { %v886_v53 = vmul.f32 0.05, %v814_v49  ;;  %v817_v54 = vadd.f32 %v1656_v52, %v2450_v47  ;;  %v808_v55 = vpop.f32.mrb[3].mxu1  ;;  %vm870_vm0 = vcmp.ge.f32.partialorder %v814_v49, 0.0 }
 0x273   : > { %v884_v56 = vmul.f32 0.05, %v806_v51  ;;  %v809_v57 = vadd.f32 %v2450_v47, %v808_v55  ;;  %vm868_vm1 = vcmp.ge.f32.partialorder %v806_v51, 0.0 }
 0x274   : > { %vm871_vm2 = vcmp.ge.f32.partialorder %v817_v54, 0.0  ;;  %v887_v58 = vmul.f32 0.05, %v817_v54  ;;  %v902_v60 = vsel %vm870_vm0, %v814_v49, %v886_v53 }
 0x275   : > { %vm869_vm3 = vcmp.ge.f32.partialorder %v809_v57, 0.0  ;;  %v885_v59 = vmul.f32 0.05, %v809_v57  ;;  %v900_v0 = vsel %vm868_vm1, %v806_v51, %v884_v56 }
 0x276   : > { %v903_v61 = vsel %vm871_vm2, %v817_v54, %v887_v58  ;;  %v1863_v58 = vld [vmem:[#allocation10 + $0x38] sm:$0xff]  }
 0x277   : > { %v917_v62 = vpack.c.bf16 %v903_v61, %v902_v60  ;;  %v1659_v63 = vpop.f32.mrb[4].mxu1  ;;  %v901_v1 = vsel %vm869_vm3, %v809_v57, %v885_v59  ;;  %v1862_v57 = vld [vmem:[#allocation10 + $0x30] sm:$0xff]  }
 0x278   : > { %v830_v2 = vadd.f32 %v1659_v63, %v2450_v47  ;;  %v821_v3 = vpop.f32.mrb[5].mxu1  ;;  %v916_v4 = vpack.c.bf16 %v901_v1, %v900_v0  ;;  %1713 = vmatprep.subr.bf16.mxu1 %v1862_v57 }
 0x279   : > { %v822_v5 = vadd.f32 %v2450_v47, %v821_v3  ;;  %v1660_v6 = vpop.f32.mrb[6].mxu1  ;;  %1714 = vmatpush3.bf16.msra.mxu1 %v1862_v57 }
 0x27a   : > { %v890_v7 = vmul.f32 0.05, %v830_v2  ;;  %v833_v8 = vadd.f32 %v1660_v6, %v2450_v47  ;;  %v824_v9 = vpop.f32.mrb[7].mxu1  ;;  %1685 = vmatprep.mubr.bf16.mxu0 %v916_v4  ;;  %vm874_vm4 = vcmp.ge.f32.partialorder %v830_v2, 0.0  ;;  %1715 = vmatprep.subr.bf16.mxu1 %v1863_v58 }
 0x27b   : > { %v888_v10 = vmul.f32 0.05, %v822_v5  ;;  %v825_v11 = vadd.f32 %v2450_v47, %v824_v9  ;;  %1686 = vmatmul.mubr.bf16.vlgmr.msra.gmra.mrb[16].mxu0 %v917_v62  ;;  %vm872_vm5 = vcmp.ge.f32.partialorder %v822_v5, 0.0 }
 0x27c   : > { %vm875_vm6 = vcmp.ge.f32.partialorder %v833_v8, 0.0  ;;  %v891_v12 = vmul.f32 0.05, %v833_v8  ;;  %v906_v14 = vsel %vm874_vm4, %v830_v2, %v890_v7 }
 0x27d   : > { %vm873_vm7 = vcmp.ge.f32.partialorder %v825_v11, 0.0  ;;  %v889_v13 = vmul.f32 0.05, %v825_v11  ;;  %v904_v17 = vsel %vm872_vm5, %v822_v5, %v888_v10  ;;  %1716 = vmatpush3.bf16.msra.mxu1 %v1863_v58 }
 0x27e   : > { %v907_v15 = vsel %vm875_vm6, %v833_v8, %v891_v12 }
 0x27f   : > { %v1663_v16 = vpop.f32.mrb[8].mxu1  ;;  %v905_v18 = vsel %vm873_vm7, %v825_v11, %v889_v13  ;;  %v919_v19 = vpack.c.bf16 %v907_v15, %v906_v14 }
 0x280   : > { %v846_v20 = vadd.f32 %v1663_v16, %v2450_v47  ;;  %v837_v21 = vpop.f32.mrb[9].mxu1  ;;  %v918_v22 = vpack.c.bf16 %v905_v18, %v904_v17 }
 0x281   : > { %v838_v23 = vadd.f32 %v2450_v47, %v837_v21  ;;  %v1664_v24 = vpop.f32.mrb[10].mxu1 }
 0x282   : > { %v894_v25 = vmul.f32 0.05, %v846_v20  ;;  %v849_v26 = vadd.f32 %v1664_v24, %v2450_v47  ;;  %v840_v27 = vpop.f32.mrb[11].mxu1  ;;  %1689 = vmatprep.mubr.bf16.mxu0 %v918_v22  ;;  %vm878_vm8 = vcmp.ge.f32.partialorder %v846_v20, 0.0 }
 0x283   : > { %v892_v28 = vmul.f32 0.05, %v838_v23  ;;  %v841_v29 = vadd.f32 %v2450_v47, %v840_v27  ;;  %1690 = vmatmul.mubr.bf16.gmra.mrb[20].mxu0 %v919_v19  ;;  %vm876_vm9 = vcmp.ge.f32.partialorder %v838_v23, 0.0 }
 0x284   : > { %vm879_vm10 = vcmp.ge.f32.partialorder %v849_v26, 0.0  ;;  %v895_v31 = vmul.f32 0.05, %v849_v26  ;;  %v910_v33 = vsel %vm878_vm8, %v846_v20, %v894_v25 }
 0x285   : > { %vm877_vm11 = vcmp.ge.f32.partialorder %v841_v29, 0.0  ;;  %v893_v32 = vmul.f32 0.05, %v841_v29  ;;  %v908_v36 = vsel %vm876_vm9, %v838_v23, %v892_v28 }
 0x286   : > { %v911_v34 = vsel %vm879_vm10, %v849_v26, %v895_v31 }
 0x287   : > { %v1667_v35 = vpop.f32.mrb[12].mxu1  ;;  %v909_v37 = vsel %vm877_vm11, %v841_v29, %v893_v32  ;;  %v921_v38 = vpack.c.bf16 %v911_v34, %v910_v33 }
 0x288   : > { %v862_v39 = vadd.f32 %v1667_v35, %v2450_v47  ;;  %v853_v40 = vpop.f32.mrb[13].mxu1  ;;  %v920_v41 = vpack.c.bf16 %v909_v37, %v908_v36 }
 0x289   : > { %v854_v30 = vadd.f32 %v2450_v47, %v853_v40  ;;  %v1668_v42 = vpop.f32.mrb[14].mxu1 }
 0x28a   : > { %v898_v43 = vmul.f32 0.05, %v862_v39  ;;  %v865_v44 = vadd.f32 %v1668_v42, %v2450_v47  ;;  %v856_v45 = vpop.f32.mrb[15].mxu1  ;;  %1693 = vmatprep.mubr.bf16.mxu0 %v920_v41  ;;  %vm882_vm12 = vcmp.ge.f32.partialorder %v862_v39, 0.0 }
 0x28b   : > { %v896_v46 = vmul.f32 0.05, %v854_v30  ;;  %v857_v48 = vadd.f32 %v2450_v47, %v856_v45  ;;  %1694 = vmatmul.mubr.bf16.gmra.mrb[24].mxu0 %v921_v38  ;;  %vm880_vm13 = vcmp.ge.f32.partialorder %v854_v30, 0.0  ;;  %v2471_v47 = vld [vmem:[%s2586_s6] ss:$0 sm:$0xff] }
 0x28c   : > { %vm883_vm14 = vcmp.ge.f32.partialorder %v865_v44, 0.0  ;;  %v899_v49 = vmul.f32 0.05, %v865_v44  ;;  %v914_v51 = vsel %vm882_vm12, %v862_v39, %v898_v43 }
 0x28d   : > { %vm881_vm15 = vcmp.ge.f32.partialorder %v857_v48, 0.0  ;;  %v897_v50 = vmul.f32 0.05, %v857_v48  ;;  %v912_v53 = vsel %vm880_vm13, %v854_v30, %v896_v46 }
 0x28e   : > { %v915_v52 = vsel %vm883_vm14, %v865_v44, %v899_v49 }
 0x28f   : > { %v913_v54 = vsel %vm881_vm15, %v857_v48, %v897_v50  ;;  %v923_v55 = vpack.c.bf16 %v915_v52, %v914_v51 }
 0x290   : > { %v922_v56 = vpack.c.bf16 %v913_v54, %v912_v53 }
 0x292   : > { %1697 = vmatprep.mubr.bf16.mxu0 %v922_v56 }
 0x293   : > { %1698 = vmatmul.mubr.bf16.gmra.mrb[28].mxu0 %v923_v55 }
 0x34e   : > { %v1687_v59 = vpop.f32.mrb[16].mxu0 }
 0x34f   : > { %v1038_v60 = vadd.f32 %v1687_v59, %v2471_v47  ;;  %v1029_v61 = vpop.f32.mrb[17].mxu0 }
 0x350   : > { %v1030_v62 = vadd.f32 %v2471_v47, %v1029_v61  ;;  %v1688_v63 = vpop.f32.mrb[18].mxu0 }
 0x351   : > { %v1110_v0 = vmul.f32 0.05, %v1038_v60  ;;  %v1041_v1 = vadd.f32 %v1688_v63, %v2471_v47  ;;  %v1032_v2 = vpop.f32.mrb[19].mxu0  ;;  %vm1094_vm0 = vcmp.ge.f32.partialorder %v1038_v60, 0.0 }
 0x352   : > { %v1108_v3 = vmul.f32 0.05, %v1030_v62  ;;  %v1033_v4 = vadd.f32 %v2471_v47, %v1032_v2  ;;  %vm1092_vm1 = vcmp.ge.f32.partialorder %v1030_v62, 0.0 }
 0x353   : > { %vm1095_vm2 = vcmp.ge.f32.partialorder %v1041_v1, 0.0  ;;  %v1111_v5 = vmul.f32 0.05, %v1041_v1  ;;  %v1126_v7 = vsel %vm1094_vm0, %v1038_v60, %v1110_v0 }
 0x354   : > { %vm1093_vm3 = vcmp.ge.f32.partialorder %v1033_v4, 0.0  ;;  %v1109_v6 = vmul.f32 0.05, %v1033_v4  ;;  %v1124_v11 = vsel %vm1092_vm1, %v1030_v62, %v1108_v3 }
 0x355   : > { %v1127_v8 = vsel %vm1095_vm2, %v1041_v1, %v1111_v5 }
 0x356   : > { %v1141_v9 = vpack.c.bf16 %v1127_v8, %v1126_v7  ;;  %v1691_v10 = vpop.f32.mrb[20].mxu0  ;;  %v1125_v12 = vsel %vm1093_vm3, %v1033_v4, %v1109_v6  ;;  %v2492_v4 = vld [vmem:[%s2588_s8] ss:$0 sm:$0xff] }
 0x357   : > { %v1054_v13 = vadd.f32 %v1691_v10, %v2471_v47  ;;  %v1045_v14 = vpop.f32.mrb[21].mxu0  ;;  %v1140_v15 = vpack.c.bf16 %v1125_v12, %v1124_v11 }
 0x358   : > { %v1046_v16 = vadd.f32 %v2471_v47, %v1045_v14  ;;  %v1692_v17 = vpop.f32.mrb[22].mxu0 }
 0x359   : > { %v1114_v18 = vmul.f32 0.05, %v1054_v13  ;;  %v1057_v19 = vadd.f32 %v1692_v17, %v2471_v47  ;;  %v1048_v20 = vpop.f32.mrb[23].mxu0  ;;  %1717 = vmatprep.mubr.bf16.mxu1 %v1140_v15  ;;  %vm1098_vm4 = vcmp.ge.f32.partialorder %v1054_v13, 0.0 }
 0x35a   : > { %v1112_v21 = vmul.f32 0.05, %v1046_v16  ;;  %v1049_v22 = vadd.f32 %v2471_v47, %v1048_v20  ;;  %1718 = vmatmul.mubr.bf16.vlgmr.msra.gmra.mrb[16].mxu1 %v1141_v9  ;;  %vm1096_vm5 = vcmp.ge.f32.partialorder %v1046_v16, 0.0 }
 0x35b   : > { %vm1099_vm6 = vcmp.ge.f32.partialorder %v1057_v19, 0.0  ;;  %v1115_v23 = vmul.f32 0.05, %v1057_v19  ;;  %v1130_v25 = vsel %vm1098_vm4, %v1054_v13, %v1114_v18 }
 0x35c   : > { %vm1097_vm7 = vcmp.ge.f32.partialorder %v1049_v22, 0.0  ;;  %v1113_v24 = vmul.f32 0.05, %v1049_v22  ;;  %v1128_v28 = vsel %vm1096_vm5, %v1046_v16, %v1112_v21 }
 0x35d   : > { %v1131_v26 = vsel %vm1099_vm6, %v1057_v19, %v1115_v23 }
 0x35e   : > { %v1695_v27 = vpop.f32.mrb[24].mxu0  ;;  %v1129_v29 = vsel %vm1097_vm7, %v1049_v22, %v1113_v24  ;;  %v1143_v31 = vpack.c.bf16 %v1131_v26, %v1130_v25 }
 0x35f   : > { %v1070_v32 = vadd.f32 %v1695_v27, %v2471_v47  ;;  %v1061_v33 = vpop.f32.mrb[25].mxu0  ;;  %v1142_v34 = vpack.c.bf16 %v1129_v29, %v1128_v28 }
 0x360   : > { %v1062_v35 = vadd.f32 %v2471_v47, %v1061_v33  ;;  %v1696_v36 = vpop.f32.mrb[26].mxu0 }
 0x361   : > { %v1118_v37 = vmul.f32 0.05, %v1070_v32  ;;  %v1073_v38 = vadd.f32 %v1696_v36, %v2471_v47  ;;  %v1064_v39 = vpop.f32.mrb[27].mxu0  ;;  %1721 = vmatprep.mubr.bf16.mxu1 %v1142_v34  ;;  %vm1102_vm8 = vcmp.ge.f32.partialorder %v1070_v32, 0.0 }
 0x362   : > { %v1116_v40 = vmul.f32 0.05, %v1062_v35  ;;  %v1065_v41 = vadd.f32 %v2471_v47, %v1064_v39  ;;  %1722 = vmatmul.mubr.bf16.gmra.mrb[20].mxu1 %v1143_v31  ;;  %vm1100_vm9 = vcmp.ge.f32.partialorder %v1062_v35, 0.0 }
 0x363   : > { %vm1103_vm10 = vcmp.ge.f32.partialorder %v1073_v38, 0.0  ;;  %v1119_v30 = vmul.f32 0.05, %v1073_v38  ;;  %v1134_v43 = vsel %vm1102_vm8, %v1070_v32, %v1118_v37 }
 0x364   : > { %vm1101_vm11 = vcmp.ge.f32.partialorder %v1065_v41, 0.0  ;;  %v1117_v42 = vmul.f32 0.05, %v1065_v41  ;;  %v1132_v46 = vsel %vm1100_vm9, %v1062_v35, %v1116_v40 }
 0x365   : > { %v1135_v44 = vsel %vm1103_vm10, %v1073_v38, %v1119_v30 }
 0x366   : > { %v1699_v45 = vpop.f32.mrb[28].mxu0  ;;  %v1133_v48 = vsel %vm1101_vm11, %v1065_v41, %v1117_v42  ;;  %v1145_v49 = vpack.c.bf16 %v1135_v44, %v1134_v43 }
 0x367   : > { %v1086_v50 = vadd.f32 %v1699_v45, %v2471_v47  ;;  %v1077_v51 = vpop.f32.mrb[29].mxu0  ;;  %v1144_v52 = vpack.c.bf16 %v1133_v48, %v1132_v46 }
 0x368   : > { %v1078_v53 = vadd.f32 %v2471_v47, %v1077_v51  ;;  %v1700_v54 = vpop.f32.mrb[30].mxu0 }
 0x369   : > { %v1122_v55 = vmul.f32 0.05, %v1086_v50  ;;  %v1089_v56 = vadd.f32 %v1700_v54, %v2471_v47  ;;  %v1080_v57 = vpop.f32.mrb[31].mxu0  ;;  %1725 = vmatprep.mubr.bf16.mxu1 %v1144_v52  ;;  %vm1106_vm12 = vcmp.ge.f32.partialorder %v1086_v50, 0.0 }
 0x36a   : > { %v1120_v58 = vmul.f32 0.05, %v1078_v53  ;;  %v1081_v59 = vadd.f32 %v2471_v47, %v1080_v57  ;;  %1726 = vmatmul.mubr.bf16.gmra.mrb[24].mxu1 %v1145_v49  ;;  %vm1104_vm13 = vcmp.ge.f32.partialorder %v1078_v53, 0.0 }
 0x36b   : > { %vm1107_vm14 = vcmp.ge.f32.partialorder %v1089_v56, 0.0  ;;  %v1123_v60 = vmul.f32 0.05, %v1089_v56  ;;  %v1138_v62 = vsel %vm1106_vm12, %v1086_v50, %v1122_v55 }
 0x36c   : > { %vm1105_vm15 = vcmp.ge.f32.partialorder %v1081_v59, 0.0  ;;  %v1121_v61 = vmul.f32 0.05, %v1081_v59  ;;  %v1136_v0 = vsel %vm1104_vm13, %v1078_v53, %v1120_v58 }
 0x36d   : > { %v1139_v63 = vsel %vm1107_vm14, %v1089_v56, %v1123_v60 }
 0x36e   : > { %v1137_v1 = vsel %vm1105_vm15, %v1081_v59, %v1121_v61  ;;  %v1147_v2 = vpack.c.bf16 %v1139_v63, %v1138_v62 }
 0x36f   : > { %v1146_v3 = vpack.c.bf16 %v1137_v1, %v1136_v0 }
 0x371   : > { %1729 = vmatprep.mubr.bf16.mxu1 %v1146_v3 }
 0x372   : > { %1730 = vmatmul.mubr.bf16.gmra.mrb[28].mxu1 %v1147_v2 }
 0x42d   : > { %v1719_v47 = vpop.f32.mrb[16].mxu1 }
 0x42e   : > { %v1262_v5 = vadd.f32 %v1719_v47, %v2492_v4  ;;  %v1253_v6 = vpop.f32.mrb[17].mxu1 }
 0x42f   : > { %v1254_v7 = vadd.f32 %v2492_v4, %v1253_v6  ;;  %v1720_v8 = vpop.f32.mrb[18].mxu1 }
 0x430   : > { %1864 = vtanh.f32 %v1262_v5  ;;  %v1265_v9 = vadd.f32 %v1720_v8, %v2492_v4  ;;  %v1256_v10 = vpop.f32.mrb[19].mxu1 }
 0x431   : > { %1866 = vtanh.f32 %v1254_v7  ;;  %v1257_v11 = vadd.f32 %v2492_v4, %v1256_v10 }
 0x432   : > { %1868 = vtanh.f32 %v1265_v9 }
 0x433   : > { %1870 = vtanh.f32 %v1257_v11 }
 0x435   : > { %v1723_v12 = vpop.f32.mrb[20].mxu1 }
 0x436   : > { %v1278_v13 = vadd.f32 %v1723_v12, %v2492_v4  ;;  %v1269_v14 = vpop.f32.mrb[21].mxu1 }
 0x437   : > { %v1270_v15 = vadd.f32 %v2492_v4, %v1269_v14  ;;  %v1724_v16 = vpop.f32.mrb[22].mxu1 }
 0x438   : > { %1872 = vtanh.f32 %v1278_v13  ;;  %v1281_v17 = vadd.f32 %v1724_v16, %v2492_v4  ;;  %v1272_v18 = vpop.f32.mrb[23].mxu1 }
 0x439   : > { %1874 = vtanh.f32 %v1270_v15  ;;  %v1273_v19 = vadd.f32 %v2492_v4, %v1272_v18 }
 0x43a   : > { %v1865_v20 = vpop.eup %1864  ;;  %1876 = vtanh.f32 %v1281_v17 }
 0x43b   : > { %v1867_v21 = vpop.eup %1866  ;;  %1334 = vst [vmem:[%s2503_s16 + $0x10] sm:$0xff] %v1865_v20  ;;  %1878 = vtanh.f32 %v1273_v19 }
 0x43c   : > { %v1869_v22 = vpop.eup %1868  ;;  %1332 = vst [vmem:[%s2503_s16] sm:$0xff] %v1867_v21 }
 0x43d   : > { %v1871_v23 = vpop.eup %1870  ;;  %1335 = vst [vmem:[%s2503_s16 + $0x18] sm:$0xff] %v1869_v22  ;;  %v1727_v24 = vpop.f32.mrb[24].mxu1 }
 0x43e   : > { %1333 = vst [vmem:[%s2503_s16 + $0x8] sm:$0xff] %v1871_v23  ;;  %v1294_v25 = vadd.f32 %v1727_v24, %v2492_v4  ;;  %v1285_v26 = vpop.f32.mrb[25].mxu1 }
 0x43f   : > { %v1286_v27 = vadd.f32 %v2492_v4, %v1285_v26  ;;  %v1728_v28 = vpop.f32.mrb[26].mxu1 }
 0x440   : > { %1880 = vtanh.f32 %v1294_v25  ;;  %v1297_v29 = vadd.f32 %v1728_v28, %v2492_v4  ;;  %v1288_v31 = vpop.f32.mrb[27].mxu1 }
 0x441   : > { %1882 = vtanh.f32 %v1286_v27  ;;  %v1289_v32 = vadd.f32 %v2492_v4, %v1288_v31 }
 0x442   : > { %v1873_v33 = vpop.eup %1872  ;;  %1884 = vtanh.f32 %v1297_v29 }
 0x443   : > { %v1875_v34 = vpop.eup %1874  ;;  %1338 = vst [vmem:[%s2503_s16 + $0x30] sm:$0xff] %v1873_v33  ;;  %1886 = vtanh.f32 %v1289_v32 }
 0x444   : > { %v1877_v35 = vpop.eup %1876  ;;  %1336 = vst [vmem:[%s2503_s16 + $0x20] sm:$0xff] %v1875_v34 }
 0x445   : > { %v1879_v36 = vpop.eup %1878  ;;  %1339 = vst [vmem:[%s2503_s16 + $0x38] sm:$0xff] %v1877_v35  ;;  %v1731_v37 = vpop.f32.mrb[28].mxu1 }
 0x446   : > { %1337 = vst [vmem:[%s2503_s16 + $0x28] sm:$0xff] %v1879_v36  ;;  %v1310_v38 = vadd.f32 %v1731_v37, %v2492_v4  ;;  %v1301_v39 = vpop.f32.mrb[29].mxu1 }
 0x447   : > { %v1302_v40 = vadd.f32 %v2492_v4, %v1301_v39  ;;  %v1732_v41 = vpop.f32.mrb[30].mxu1 }
 0x448   : > { %1888 = vtanh.f32 %v1310_v38  ;;  %v1313_v30 = vadd.f32 %v1732_v41, %v2492_v4  ;;  %v1304_v42 = vpop.f32.mrb[31].mxu1 }
 0x449   : > { %1890 = vtanh.f32 %v1302_v40  ;;  %v1305_v43 = vadd.f32 %v2492_v4, %v1304_v42 }
 0x44a   : > { %v1881_v44 = vpop.eup %1880  ;;  %1892 = vtanh.f32 %v1313_v30 }
 0x44b   : > { %v1883_v45 = vpop.eup %1882  ;;  %1342 = vst [vmem:[%s2503_s16 + $0x50] sm:$0xff] %v1881_v44  ;;  %1894 = vtanh.f32 %v1305_v43 }
 0x44c   : > { %v1885_v46 = vpop.eup %1884  ;;  %1340 = vst [vmem:[%s2503_s16 + $0x40] sm:$0xff] %v1883_v45 }
 0x44d   : > { %v1887_v48 = vpop.eup %1886  ;;  %1343 = vst [vmem:[%s2503_s16 + $0x58] sm:$0xff] %v1885_v46 }
 0x44e   : > { %1341 = vst [vmem:[%s2503_s16 + $0x48] sm:$0xff] %v1887_v48 }
 0x452   : > { %v1889_v49 = vpop.eup %1888 }
 0x453   : > { %v1891_v50 = vpop.eup %1890  ;;  %1346 = vst [vmem:[%s2503_s16 + $0x70] sm:$0xff] %v1889_v49 }
 0x454   : > { %v1893_v51 = vpop.eup %1892  ;;  %1344 = vst [vmem:[%s2503_s16 + $0x60] sm:$0xff] %v1891_v50 }
 0x455   : > { %v1895_v52 = vpop.eup %1894  ;;  %1347 = vst [vmem:[%s2503_s16 + $0x78] sm:$0xff] %v1893_v51 }
 0x456   : > { %1345 = vst [vmem:[%s2503_s16 + $0x68] sm:$0xff] %v1895_v52 }
 0x457   : > { %2051 = shalt.err (!%p2048_p13)
}
 0x458   : > { %s2052_s9 = scalar_lea.hbm %s2531_s17, 2048  ;;  %s2056_s16 = scalar_lea.hbm %s2613_s15, 4096 }
 0x459   : > { %p2053_p9 = scmp.ne.s32.totalorder %s2531_s17, %s2052_s9  ;;  %p2057_p4 = scmp.lt.u32.totalorder %s2531_s17, %s2613_s15 }
 0x45a   : > { %p2058_p8 = scmp.lt.u32.totalorder %s2056_s16, %s2052_s9  ;;  %p2060_p3 = scmp.lt.u32.totalorder %s2052_s9, %s2531_s17 }
 0x45b   : > { %p2054_p0 = pnand %p2053_p9, %p2345_p10 }
 0x45c   : > { %p2059_p6 = por %p2058_p8, %p2057_p4 }
 0x45d   : > { %p2055_p11 = pneg %p2054_p0 }
 0x45e   : > { %p2061_p5 = por %p2060_p3, %p2059_p6 }
 0x460   : > { %p2062_p7 = pnand %p2061_p5, %p2055_p11 }
 0x462   : > { %2065 = shalt.err (!%p2062_p7)
}
 0x463   : > { %s2122_s29 = smov 128   ;;  %s2123_s25 = smov 8  }
 0x464   : > { %1751 = dma.vmem_to_hbm [thread:$0]  (%p2345_p10), %s2533_s21, 2048, %s2531_s17, %s1349_s13, %s2122_s29, %s2122_s29, %s2123_s25  }
 0x465 PF: > { %s2614_s26 = sld [smem:[#allocation16_spill]]  ;;  %s2615_s19 = sld [smem:[#allocation17_spill]] }
 0x466   : > { %p2617_p1 = scmp.ge.s32.totalorder %s2112_s12, 2 }
 0x46b   : > { %s1377_s22 = sand.u32 1, %s2614_s26   ;;  %p2616_p12 = scmp.ne.s32.totalorder %s2615_s19, 0 }
 0x46c   : > { %s1378_s9 = scalar_lea.sflag [#allocation4], %s1377_s22 }
 0x46d   : > { %p1771_p2 = pnand %p2617_p1, %p2616_p12 }
 0x46f   : > { %2095 = dma.done.wait (!%p1771_p2), %s1378_s9, 2048  }
 0x470   : > { %2097 = vsyncadd (!%p1771_p2), %s1378_s9, 4294965248  ;;  %p24_p13 = scmp.ge.s32.totalorder %s2335_s14, 4   ;;  %s2618_s30 = smov %s2104_s10 }
 0x471   : > { %s2619_s10 = smov %s2108_s11  ;;  %s2620_s11 = smov %s2351_s28 }
 0x472   : > { %s2621_s12 = smov %s2335_s14  ;;  %26 = sbr.rel (!%p24_p13) target bundleno = 9 (0x9), region = 117 }
 0x479   :  { %1383 = vsyncpa [#allocation3], 1 }
 0x47a   :  { %1385 = vsyncpa [#allocation3 + $0x1], 1 }
 0x47b   :  { %1386 = vsyncpa [#allocation6], 1 }
 0x47c   :  { %1387 = vsyncpa [#allocation9], 1 }
 0x47d   :  { %1388 = vsyncpa [#allocation4], 1 }
 0x47e   :  { %1390 = vsyncpa [#allocation4 + $0x1], 1 }

</bundles_post_ra>
